<compile_context>
chip_gen: v5e
topology: v5e:2x2
jax: 0.10.0
libtpu: 0.0.40
codegen_flags: <defaults>
</compile_context>

<pallas_src>
import functools
import math

import jax
import jax.numpy as jnp
from jax import lax
from jax.experimental import pallas as pl
from jax.experimental.pallas import tpu as pltpu


# ----------------------------------------------------------------------------
# Fused TUPE-MHA forward kernel: one grid step = one batch element, all heads.
# ----------------------------------------------------------------------------
def _tupe_mha_fused_kernel(x_ref, pe_ref, wx_ref, wpe_ref, wo_t_ref, per_ref,
                           o_ref, *, num_heads, head_dim):
    # x_ref    : [1, L, Din]  (compute dtype)
    # pe_ref   : [1, L, E]    (compute dtype)
    # wx_ref   : [Din, 5E]    (compute dtype, VMEM-resident, per-head layout)
    # wpe_ref  : [E,   5E]    (compute dtype, VMEM-resident, per-head layout)
    # wo_t_ref : [E, E]       (compute dtype, VMEM-resident)
    # per_ref  : [H, L, L]    (f32, shared across batch, VMEM-resident)
    # o_ref    : [1, L, E]    (f32)
    cdt = x_ref.dtype
    hd = head_dim
    E = wo_t_ref.shape[0]

    x = x_ref[0]        # [L, Din]
    pe = pe_ref[0]      # [L, E]

    # Fused input projection (f32 MXU accumulation), then one cast to the
    # compute dtype.  Columns are already per-head [q|uq], [k|uk], [v] blocks
    # with the 1/sqrt(2*hd) scale folded into the q-side weights.
    proj = (jnp.dot(x, wx_ref[...], preferred_element_type=jnp.float32)
            + jnp.dot(pe, wpe_ref[...], preferred_element_type=jnp.float32))  # [L, 5E]
    proj_c = proj.astype(cdt)

    head_outs = []
    for h in range(num_heads):          # static, unrolled; contiguous slices
        qo = h * 2 * hd
        ko = 2 * E + h * 2 * hd
        vo = 4 * E + h * hd
        qc = proj_c[:, qo:qo + 2 * hd]        # [L, 2hd] = [q_h*s | uq_h*s]
        kc = proj_c[:, ko:ko + 2 * hd]        # [L, 2hd] = [k_h   | uk_h  ]
        v = proj_c[:, vo:vo + hd]             # [L, hd]

        # word_attn + pe_attn in ONE MXU pass (contract last dims, no k.T).
        logits = lax.dot_general(
            qc, kc, (((1,), (1,)), ((), ())),
            preferred_element_type=jnp.float32)            # [L, L]
        logits = logits + per_ref[h]                       # PE_r shared over B

        # Numerically stable softmax in f32; divide goes to the EUP slot.
        m = jnp.max(logits, axis=-1, keepdims=True)
        e = jnp.exp(logits - m)
        s = jnp.sum(e, axis=-1, keepdims=True)
        attn = e * pl.reciprocal(s, approx=True)

        head_outs.append(
            jnp.dot(attn.astype(cdt), v,
                    preferred_element_type=jnp.float32))   # [L, hd]

    # Head-major concat -> [L, E] (matches torch permute+reshape), fused Wo.
    vals = jnp.concatenate(head_outs, axis=-1).astype(cdt)
    o_ref[0] = jnp.dot(vals, wo_t_ref[...],
                       preferred_element_type=jnp.float32).astype(o_ref.dtype)


# ----------------------------------------------------------------------------
# Host-side one-time weight packing into the per-head fused layout.
# ----------------------------------------------------------------------------
def _pack_weights(params, num_heads, compute_dtype):
    Wqkv = params["Wqkv"]       # [3E, Din]  torch Linear layout: [out, in]
    UqUk = params["UqUk"]       # [2E, E]
    Wo = params["Wo"]           # [E, E]
    Din = Wqkv.shape[1]
    E = Wo.shape[0]
    H = num_heads
    hd = E // H
    scale = 1.0 / math.sqrt(2.0 * hd)

    # Split per head (matches torch reshape(B,L,H,3hd) / chunk ordering).
    Wq, Wk, Wv = (Wqkv.reshape(H, 3, hd, Din)[:, i] for i in range(3))  # [H,hd,Din]
    Uq, Uk = (UqUk.reshape(H, 2, hd, E)[:, i] for i in range(2))        # [H,hd,E]

    WqT = jnp.swapaxes(Wq, 1, 2)    # [H, Din, hd]
    WkT = jnp.swapaxes(Wk, 1, 2)
    WvT = jnp.swapaxes(Wv, 1, 2)
    UqT = jnp.swapaxes(Uq, 1, 2)    # [H, E, hd]
    UkT = jnp.swapaxes(Uk, 1, 2)

    zx = jnp.zeros_like(WqT)        # [H, Din, hd]
    zp = jnp.zeros_like(UqT)        # [H, E, hd]

    # Per-head column blocks: q-side gets the softmax scale folded in.
    qc_x = jnp.concatenate([WqT * scale, zx], axis=-1)     # [H, Din, 2hd]
    kc_x = jnp.concatenate([WkT, zx], axis=-1)             # [H, Din, 2hd]
    qc_p = jnp.concatenate([zp, UqT * scale], axis=-1)     # [H, E, 2hd]
    kc_p = jnp.concatenate([zp, UkT], axis=-1)             # [H, E, 2hd]

    def head_major(w):  # [H, R, c] -> [R, H*c]
        return jnp.swapaxes(w, 0, 1).reshape(w.shape[1], -1)

    w_x = jnp.concatenate(
        [head_major(qc_x), head_major(kc_x), head_major(WvT)], axis=1)   # [Din, 5E]
    w_pe = jnp.concatenate(
        [head_major(qc_p), head_major(kc_p),
         jnp.zeros((E, E), UqUk.dtype)], axis=1)                          # [E, 5E]

    return (w_x.astype(compute_dtype), w_pe.astype(compute_dtype),
            Wo.T.astype(compute_dtype))


def tupe_mha_forward(params, x, PE, PE_r, num_heads, *,
                     compute_dtype=jnp.float32):
    B, L, Din = x.shape
    E = params["Wo"].shape[0]
    assert E % num_heads == 0
    hd = E // num_heads

    w_x, w_pe, wo_t = _pack_weights(params, num_heads, compute_dtype)
    x_c = x.astype(compute_dtype)
    pe_c = PE.astype(compute_dtype)
    pe_r = PE_r.astype(jnp.float32)              # added to f32 logits

    kernel = functools.partial(_tupe_mha_fused_kernel,
                               num_heads=num_heads, head_dim=hd)

    nbytes = lambda a: int(a.size) * a.dtype.itemsize
    flops = 2 * B * (L * Din * 5 * E + L * E * 5 * E          # fused projection
                     + num_heads * L * L * 2 * hd             # logits
                     + num_heads * L * L * hd                 # attn @ v
                     + L * E * E)                             # Wo
    cost = pl.CostEstimate(
        flops=int(flops),
        transcendentals=int(B * num_heads * L * L),
        bytes_accessed=int(nbytes(x_c) + nbytes(pe_c) + nbytes(w_x)
                           + nbytes(w_pe) + nbytes(wo_t) + nbytes(pe_r)
                           + B * L * E * 4))

    return pl.pallas_call(
        kernel,
        out_shape=jax.ShapeDtypeStruct((B, L, E), jnp.float32),
        grid=(B,),
        in_specs=[
            pl.BlockSpec((1, L, Din), lambda b: (b, 0, 0)),
            pl.BlockSpec((1, L, E), lambda b: (b, 0, 0)),
            pl.BlockSpec((Din, 5 * E), lambda b: (0, 0)),           # resident
            pl.BlockSpec((E, 5 * E), lambda b: (0, 0)),             # resident
            pl.BlockSpec((E, E), lambda b: (0, 0)),                 # resident
            pl.BlockSpec((num_heads, L, L), lambda b: (0, 0, 0)),   # resident
        ],
        out_specs=pl.BlockSpec((1, L, E), lambda b: (b, 0, 0)),
        compiler_params=pltpu.CompilerParams(
            dimension_semantics=("parallel",),
            vmem_limit_bytes=32 * 1024 * 1024,   # safe on v5e/v6e/v7x
        ),
        cost_estimate=cost,
    )(x_c, pe_c, w_x, w_pe, wo_t, pe_r)


# ----------------------------------------------------------------------------
# Deterministic parameter init (xavier_uniform, same bounds as torch)
# ----------------------------------------------------------------------------
def xavier_uniform(key, shape):
    fan_out, fan_in = shape
    bound = math.sqrt(6.0 / (fan_in + fan_out))
    return jax.random.uniform(key, shape, jnp.float32, -bound, bound)


def init_params(key, input_dim, embed_dim):
    k1, k2, k3 = jax.random.split(key, 3)
    return {
        "Wqkv": xavier_uniform(k1, (3 * embed_dim, input_dim)),
        "Wo": xavier_uniform(k2, (embed_dim, embed_dim)),
        "UqUk": xavier_uniform(k3, (2 * embed_dim, embed_dim)),
    }


# ----------------------------------------------------------------------------
# Pure-jnp reference (mirrors the PyTorch module exactly)
# ----------------------------------------------------------------------------
def reference_forward(params, x, PE, PE_r, num_heads):
    B, L, _ = x.shape
    E = params["Wo"].shape[0]
    hd = E // num_heads
    qkv = x @ params["Wqkv"].T
    pe_term = PE @ params["UqUk"].T
    qkv = qkv.reshape(B, L, num_heads, 3 * hd).transpose(0, 2, 1, 3)
    pe_term = pe_term.reshape(B, L, num_heads, 2 * hd).transpose(0, 2, 1, 3)
    q, k, v = qkv[..., :hd], qkv[..., hd:2 * hd], qkv[..., 2 * hd:]
    uq, uk = pe_term[..., :hd], pe_term[..., hd:]
    scale = 1.0 / math.sqrt(2.0 * hd)
    word_attn = jnp.einsum("bhqd,bhkd->bhqk", q, k) * scale
    pe_attn = jnp.einsum("bhqd,bhkd->bhqk", uq, uk) * scale
    attn = jax.nn.softmax(word_attn + pe_attn + PE_r[None], axis=-1)
    vals = jnp.einsum("bhqk,bhkd->bhqd", attn, v)
    vals = vals.transpose(0, 2, 1, 3).reshape(B, L, E)
    return vals @ params["Wo"].T


if __name__ == "__main__":
    batch_size = 2
    patch_length = 8      # no. of patches (sequence length)
    input_dim = 32
    embed_dim = 32
    num_heads = 4

    key = jax.random.PRNGKey(0)
    kp, kx, kpe, kr = jax.random.split(key, 4)

    params = init_params(kp, input_dim, embed_dim)
    x = jax.random.normal(kx, (batch_size, patch_length, input_dim), jnp.float32)
    PE = jax.random.normal(kpe, (batch_size, patch_length, embed_dim), jnp.float32)
    PE_r = jax.random.normal(kr, (num_heads, patch_length, patch_length), jnp.float32)

    ref = reference_forward(params, x, PE, PE_r, num_heads)

    # f32 compute path (tolerance accounts for the EUP approximate reciprocal).
    out = jax.block_until_ready(
        tupe_mha_forward(params, x, PE, PE_r, num_heads,
                         compute_dtype=jnp.float32))
    assert out.shape == (batch_size, patch_length, embed_dim)
    assert jnp.allclose(out, ref, atol=1e-2, rtol=1e-2), "f32 mismatch vs reference"

    # bf16 matmul path (2x MXU / half HBM bytes); softmax stays f32 in-kernel.
    out_bf16 = jax.block_until_ready(
        tupe_mha_forward(params, x, PE, PE_r, num_heads,
                         compute_dtype=jnp.bfloat16))
    assert jnp.allclose(out_bf16, ref, atol=1e-1, rtol=1e-1), "bf16 mismatch vs reference"

    print("KERNEL_OK")
</pallas_src>

<mosaic_0001>
module attributes {stable_mosaic.version = 11 : i64} {
  func.func @_tupe_mha_fused_kernel(%arg0: i32, %arg1: memref<1x8x32xf32, #tpu.memory_space<vmem>>, %arg2: memref<1x8x32xf32, #tpu.memory_space<vmem>>, %arg3: memref<32x160xf32, #tpu.memory_space<vmem>>, %arg4: memref<32x160xf32, #tpu.memory_space<vmem>>, %arg5: memref<32x32xf32, #tpu.memory_space<vmem>>, %arg6: memref<4x8x8xf32, #tpu.memory_space<vmem>>, %arg7: memref<1x8x32xf32, #tpu.memory_space<vmem>>) attributes {dimension_semantics = [#tpu.dimension_semantics<parallel>], iteration_bounds = array<i64: 2>, scalar_prefetch = 0 : i64, scratch_operands = 0 : i64, tpu.core_type = #tpu.core_type<tc>, window_params = [{transform_indices = @transform_0, window_bounds = array<i64: 1, 8, 32>}, {transform_indices = @transform_1, window_bounds = array<i64: 1, 8, 32>}, {pipeline_mode = #tpu.pipeline_mode<synchronous>, transform_indices = @transform_2, window_bounds = array<i64: 32, 160>}, {pipeline_mode = #tpu.pipeline_mode<synchronous>, transform_indices = @transform_3, window_bounds = array<i64: 32, 160>}, {pipeline_mode = #tpu.pipeline_mode<synchronous>, transform_indices = @transform_4, window_bounds = array<i64: 32, 32>}, {pipeline_mode = #tpu.pipeline_mode<synchronous>, transform_indices = @transform_5, window_bounds = array<i64: 4, 8, 8>}, {transform_indices = @transform_6, window_bounds = array<i64: 1, 8, 32>}]} {
    %c0 = arith.constant 0 : index
    %c0_0 = arith.constant 0 : index
    %c0_1 = arith.constant 0 : index
    %0 = vector.load %arg1[%c0, %c0_0, %c0_1] : memref<1x8x32xf32, #tpu.memory_space<vmem>>, vector<1x8x32xf32>
    %1 = vector.shape_cast %0 : vector<1x8x32xf32> to vector<8x32xf32>
    %c0_2 = arith.constant 0 : index
    %c0_3 = arith.constant 0 : index
    %c0_4 = arith.constant 0 : index
    %2 = vector.load %arg2[%c0_2, %c0_3, %c0_4] : memref<1x8x32xf32, #tpu.memory_space<vmem>>, vector<1x8x32xf32>
    %3 = vector.shape_cast %2 : vector<1x8x32xf32> to vector<8x32xf32>
    %c0_5 = arith.constant 0 : index
    %c0_6 = arith.constant 0 : index
    %4 = vector.load %arg3[%c0_5, %c0_6] : memref<32x160xf32, #tpu.memory_space<vmem>>, vector<32x160xf32>
    %cst = arith.constant dense<0.000000e+00> : vector<8x160xf32>
    %5 = tpu.matmul %1, %4, %cst {dimension_numbers = #tpu.dot_dimension_numbers<[1], [0], [0], [1], [0, 0, 1, 1], [], []>} : vector<8x32xf32>, vector<32x160xf32>, vector<8x160xf32> -> vector<8x160xf32>
    %c0_7 = arith.constant 0 : index
    %c0_8 = arith.constant 0 : index
    %6 = vector.load %arg4[%c0_7, %c0_8] : memref<32x160xf32, #tpu.memory_space<vmem>>, vector<32x160xf32>
    %cst_9 = arith.constant dense<0.000000e+00> : vector<8x160xf32>
    %7 = tpu.matmul %3, %6, %cst_9 {dimension_numbers = #tpu.dot_dimension_numbers<[1], [0], [0], [1], [0, 0, 1, 1], [], []>} : vector<8x32xf32>, vector<32x160xf32>, vector<8x160xf32> -> vector<8x160xf32>
    %8 = arith.addf %5, %7 : vector<8x160xf32>
    %9 = vector.extract_strided_slice %8 {offsets = [0, 0], sizes = [8, 16], strides = [1, 1]} : vector<8x160xf32> to vector<8x16xf32>
    %10 = vector.extract_strided_slice %8 {offsets = [0, 64], sizes = [8, 16], strides = [1, 1]} : vector<8x160xf32> to vector<8x16xf32>
    %11 = vector.extract_strided_slice %8 {offsets = [0, 128], sizes = [8, 8], strides = [1, 1]} : vector<8x160xf32> to vector<8x8xf32>
    %cst_10 = arith.constant dense<0.000000e+00> : vector<8x8xf32>
    %12 = tpu.matmul %9, %10, %cst_10 {dimension_numbers = #tpu.dot_dimension_numbers<[1], [1], [0], [0], [0, 0, 1, 0], [], []>} : vector<8x16xf32>, vector<8x16xf32>, vector<8x8xf32> -> vector<8x8xf32>
    %c0_11 = arith.constant 0 : index
    %c0_12 = arith.constant 0 : index
    %c0_13 = arith.constant 0 : index
    %13 = vector.load %arg6[%c0_11, %c0_12, %c0_13] : memref<4x8x8xf32, #tpu.memory_space<vmem>>, vector<1x8x8xf32>
    %14 = vector.shape_cast %13 : vector<1x8x8xf32> to vector<8x8xf32>
    %15 = arith.addf %12, %14 : vector<8x8xf32>
    %cst_14 = arith.constant dense<0xFF800000> : vector<8xf32>
    %16 = vector.multi_reduction <maximumf>, %15, %cst_14 [1] : vector<8x8xf32> to vector<8xf32>
    %17 = vector.shape_cast %16 : vector<8xf32> to vector<8x1xf32>
    %18 = vector.broadcast %17 : vector<8x1xf32> to vector<8x8xf32>
    %19 = arith.subf %15, %18 : vector<8x8xf32>
    %20 = math.exp %19 : vector<8x8xf32>
    %cst_15 = arith.constant dense<0.000000e+00> : vector<8xf32>
    %21 = vector.multi_reduction <add>, %20, %cst_15 [1] : vector<8x8xf32> to vector<8xf32>
    %22 = vector.shape_cast %21 : vector<8xf32> to vector<8x1xf32>
    %23 = tpu.reciprocal %22 {approx = true} : vector<8x1xf32> -> vector<8x1xf32>
    %24 = vector.broadcast %23 : vector<8x1xf32> to vector<8x8xf32>
    %25 = arith.mulf %20, %24 : vector<8x8xf32>
    %cst_16 = arith.constant dense<0.000000e+00> : vector<8x8xf32>
    %26 = tpu.matmul %25, %11, %cst_16 {dimension_numbers = #tpu.dot_dimension_numbers<[1], [0], [0], [1], [0, 0, 1, 1], [], []>} : vector<8x8xf32>, vector<8x8xf32>, vector<8x8xf32> -> vector<8x8xf32>
    %27 = vector.extract_strided_slice %8 {offsets = [0, 16], sizes = [8, 16], strides = [1, 1]} : vector<8x160xf32> to vector<8x16xf32>
    %28 = vector.extract_strided_slice %8 {offsets = [0, 80], sizes = [8, 16], strides = [1, 1]} : vector<8x160xf32> to vector<8x16xf32>
    %29 = vector.extract_strided_slice %8 {offsets = [0, 136], sizes = [8, 8], strides = [1, 1]} : vector<8x160xf32> to vector<8x8xf32>
    %cst_17 = arith.constant dense<0.000000e+00> : vector<8x8xf32>
    %30 = tpu.matmul %27, %28, %cst_17 {dimension_numbers = #tpu.dot_dimension_numbers<[1], [1], [0], [0], [0, 0, 1, 0], [], []>} : vector<8x16xf32>, vector<8x16xf32>, vector<8x8xf32> -> vector<8x8xf32>
    %c1 = arith.constant 1 : index
    %c0_18 = arith.constant 0 : index
    %c0_19 = arith.constant 0 : index
    %31 = vector.load %arg6[%c1, %c0_18, %c0_19] : memref<4x8x8xf32, #tpu.memory_space<vmem>>, vector<1x8x8xf32>
    %32 = vector.shape_cast %31 : vector<1x8x8xf32> to vector<8x8xf32>
    %33 = arith.addf %30, %32 : vector<8x8xf32>
    %cst_20 = arith.constant dense<0xFF800000> : vector<8xf32>
    %34 = vector.multi_reduction <maximumf>, %33, %cst_20 [1] : vector<8x8xf32> to vector<8xf32>
    %35 = vector.shape_cast %34 : vector<8xf32> to vector<8x1xf32>
    %36 = vector.broadcast %35 : vector<8x1xf32> to vector<8x8xf32>
    %37 = arith.subf %33, %36 : vector<8x8xf32>
    %38 = math.exp %37 : vector<8x8xf32>
    %cst_21 = arith.constant dense<0.000000e+00> : vector<8xf32>
    %39 = vector.multi_reduction <add>, %38, %cst_21 [1] : vector<8x8xf32> to vector<8xf32>
    %40 = vector.shape_cast %39 : vector<8xf32> to vector<8x1xf32>
    %41 = tpu.reciprocal %40 {approx = true} : vector<8x1xf32> -> vector<8x1xf32>
    %42 = vector.broadcast %41 : vector<8x1xf32> to vector<8x8xf32>
    %43 = arith.mulf %38, %42 : vector<8x8xf32>
    %cst_22 = arith.constant dense<0.000000e+00> : vector<8x8xf32>
    %44 = tpu.matmul %43, %29, %cst_22 {dimension_numbers = #tpu.dot_dimension_numbers<[1], [0], [0], [1], [0, 0, 1, 1], [], []>} : vector<8x8xf32>, vector<8x8xf32>, vector<8x8xf32> -> vector<8x8xf32>
    %45 = vector.extract_strided_slice %8 {offsets = [0, 32], sizes = [8, 16], strides = [1, 1]} : vector<8x160xf32> to vector<8x16xf32>
    %46 = vector.extract_strided_slice %8 {offsets = [0, 96], sizes = [8, 16], strides = [1, 1]} : vector<8x160xf32> to vector<8x16xf32>
    %47 = vector.extract_strided_slice %8 {offsets = [0, 144], sizes = [8, 8], strides = [1, 1]} : vector<8x160xf32> to vector<8x8xf32>
    %cst_23 = arith.constant dense<0.000000e+00> : vector<8x8xf32>
    %48 = tpu.matmul %45, %46, %cst_23 {dimension_numbers = #tpu.dot_dimension_numbers<[1], [1], [0], [0], [0, 0, 1, 0], [], []>} : vector<8x16xf32>, vector<8x16xf32>, vector<8x8xf32> -> vector<8x8xf32>
    %c2 = arith.constant 2 : index
    %c0_24 = arith.constant 0 : index
    %c0_25 = arith.constant 0 : index
    %49 = vector.load %arg6[%c2, %c0_24, %c0_25] : memref<4x8x8xf32, #tpu.memory_space<vmem>>, vector<1x8x8xf32>
    %50 = vector.shape_cast %49 : vector<1x8x8xf32> to vector<8x8xf32>
    %51 = arith.addf %48, %50 : vector<8x8xf32>
    %cst_26 = arith.constant dense<0xFF800000> : vector<8xf32>
    %52 = vector.multi_reduction <maximumf>, %51, %cst_26 [1] : vector<8x8xf32> to vector<8xf32>
    %53 = vector.shape_cast %52 : vector<8xf32> to vector<8x1xf32>
    %54 = vector.broadcast %53 : vector<8x1xf32> to vector<8x8xf32>
    %55 = arith.subf %51, %54 : vector<8x8xf32>
    %56 = math.exp %55 : vector<8x8xf32>
    %cst_27 = arith.constant dense<0.000000e+00> : vector<8xf32>
    %57 = vector.multi_reduction <add>, %56, %cst_27 [1] : vector<8x8xf32> to vector<8xf32>
    %58 = vector.shape_cast %57 : vector<8xf32> to vector<8x1xf32>
    %59 = tpu.reciprocal %58 {approx = true} : vector<8x1xf32> -> vector<8x1xf32>
    %60 = vector.broadcast %59 : vector<8x1xf32> to vector<8x8xf32>
    %61 = arith.mulf %56, %60 : vector<8x8xf32>
    %cst_28 = arith.constant dense<0.000000e+00> : vector<8x8xf32>
    %62 = tpu.matmul %61, %47, %cst_28 {dimension_numbers = #tpu.dot_dimension_numbers<[1], [0], [0], [1], [0, 0, 1, 1], [], []>} : vector<8x8xf32>, vector<8x8xf32>, vector<8x8xf32> -> vector<8x8xf32>
    %63 = vector.extract_strided_slice %8 {offsets = [0, 48], sizes = [8, 16], strides = [1, 1]} : vector<8x160xf32> to vector<8x16xf32>
    %64 = vector.extract_strided_slice %8 {offsets = [0, 112], sizes = [8, 16], strides = [1, 1]} : vector<8x160xf32> to vector<8x16xf32>
    %65 = vector.extract_strided_slice %8 {offsets = [0, 152], sizes = [8, 8], strides = [1, 1]} : vector<8x160xf32> to vector<8x8xf32>
    %cst_29 = arith.constant dense<0.000000e+00> : vector<8x8xf32>
    %66 = tpu.matmul %63, %64, %cst_29 {dimension_numbers = #tpu.dot_dimension_numbers<[1], [1], [0], [0], [0, 0, 1, 0], [], []>} : vector<8x16xf32>, vector<8x16xf32>, vector<8x8xf32> -> vector<8x8xf32>
    %c3 = arith.constant 3 : index
    %c0_30 = arith.constant 0 : index
    %c0_31 = arith.constant 0 : index
    %67 = vector.load %arg6[%c3, %c0_30, %c0_31] : memref<4x8x8xf32, #tpu.memory_space<vmem>>, vector<1x8x8xf32>
    %68 = vector.shape_cast %67 : vector<1x8x8xf32> to vector<8x8xf32>
    %69 = arith.addf %66, %68 : vector<8x8xf32>
    %cst_32 = arith.constant dense<0xFF800000> : vector<8xf32>
    %70 = vector.multi_reduction <maximumf>, %69, %cst_32 [1] : vector<8x8xf32> to vector<8xf32>
    %71 = vector.shape_cast %70 : vector<8xf32> to vector<8x1xf32>
    %72 = vector.broadcast %71 : vector<8x1xf32> to vector<8x8xf32>
    %73 = arith.subf %69, %72 : vector<8x8xf32>
    %74 = math.exp %73 : vector<8x8xf32>
    %cst_33 = arith.constant dense<0.000000e+00> : vector<8xf32>
    %75 = vector.multi_reduction <add>, %74, %cst_33 [1] : vector<8x8xf32> to vector<8xf32>
    %76 = vector.shape_cast %75 : vector<8xf32> to vector<8x1xf32>
    %77 = tpu.reciprocal %76 {approx = true} : vector<8x1xf32> -> vector<8x1xf32>
    %78 = vector.broadcast %77 : vector<8x1xf32> to vector<8x8xf32>
    %79 = arith.mulf %74, %78 : vector<8x8xf32>
    %cst_34 = arith.constant dense<0.000000e+00> : vector<8x8xf32>
    %80 = tpu.matmul %79, %65, %cst_34 {dimension_numbers = #tpu.dot_dimension_numbers<[1], [0], [0], [1], [0, 0, 1, 1], [], []>} : vector<8x8xf32>, vector<8x8xf32>, vector<8x8xf32> -> vector<8x8xf32>
    %81 = tpu.concatenate %26, %44, %62, %80 in 1 : vector<8x8xf32>, vector<8x8xf32>, vector<8x8xf32>, vector<8x8xf32> -> vector<8x32xf32>
    %c0_35 = arith.constant 0 : index
    %c0_36 = arith.constant 0 : index
    %82 = vector.load %arg5[%c0_35, %c0_36] : memref<32x32xf32, #tpu.memory_space<vmem>>, vector<32x32xf32>
    %cst_37 = arith.constant dense<0.000000e+00> : vector<8x32xf32>
    %83 = tpu.matmul %81, %82, %cst_37 {dimension_numbers = #tpu.dot_dimension_numbers<[1], [0], [0], [1], [0, 0, 1, 1], [], []>} : vector<8x32xf32>, vector<32x32xf32>, vector<8x32xf32> -> vector<8x32xf32>
    %c0_38 = arith.constant 0 : index
    %c0_39 = arith.constant 0 : index
    %c0_40 = arith.constant 0 : index
    %84 = vector.load %arg7[%c0_38, %c0_39, %c0_40] : memref<1x8x32xf32, #tpu.memory_space<vmem>>, vector<1x8x32xf32>
    %85 = vector.shape_cast %84 : vector<1x8x32xf32> to vector<8x32xf32>
    %86 = vector.shape_cast %83 : vector<8x32xf32> to vector<1x8x32xf32>
    tpu.vector_store %arg7[%c0_38, %c0_39, %c0_40], %86 {strides = array<i32>} : memref<1x8x32xf32, #tpu.memory_space<vmem>>, vector<1x8x32xf32>,
    return
  }
  func.func @transform_0(%arg0: i32) -> (i32, i32, i32) {
    %c0_i32 = arith.constant 0 : i32
    %c0_i32_0 = arith.constant 0 : i32
    %c0_i32_1 = arith.constant 0 : i32
    return %arg0, %c0_i32, %c0_i32_0 : i32, i32, i32
  }
  func.func @transform_1(%arg0: i32) -> (i32, i32, i32) {
    %c0_i32 = arith.constant 0 : i32
    %c0_i32_0 = arith.constant 0 : i32
    %c0_i32_1 = arith.constant 0 : i32
    return %arg0, %c0_i32, %c0_i32_0 : i32, i32, i32
  }
  func.func @transform_2(%arg0: i32) -> (i32, i32) {
    %c0_i32 = arith.constant 0 : i32
    %c0_i32_0 = arith.constant 0 : i32
    %c0_i32_1 = arith.constant 0 : i32
    return %c0_i32, %c0_i32_0 : i32, i32
  }
  func.func @transform_3(%arg0: i32) -> (i32, i32) {
    %c0_i32 = arith.constant 0 : i32
    %c0_i32_0 = arith.constant 0 : i32
    %c0_i32_1 = arith.constant 0 : i32
    return %c0_i32, %c0_i32_0 : i32, i32
  }
  func.func @transform_4(%arg0: i32) -> (i32, i32) {
    %c0_i32 = arith.constant 0 : i32
    %c0_i32_0 = arith.constant 0 : i32
    %c0_i32_1 = arith.constant 0 : i32
    return %c0_i32, %c0_i32_0 : i32, i32
  }
  func.func @transform_5(%arg0: i32) -> (i32, i32, i32) {
    %c0_i32 = arith.constant 0 : i32
    %c0_i32_0 = arith.constant 0 : i32
    %c0_i32_1 = arith.constant 0 : i32
    %c0_i32_2 = arith.constant 0 : i32
    return %c0_i32, %c0_i32_0, %c0_i32_1 : i32, i32, i32
  }
  func.func @transform_6(%arg0: i32) -> (i32, i32, i32) {
    %c0_i32 = arith.constant 0 : i32
    %c0_i32_0 = arith.constant 0 : i32
    %c0_i32_1 = arith.constant 0 : i32
    return %arg0, %c0_i32, %c0_i32_0 : i32, i32, i32
  }
}

</mosaic_0001>

<bundles_post_ra>
// kernel: tpu_custom_call.1
= control target key start
LH: loop header
LB: loop body
LE: loop exit
PB: predicated region body
PF: predicated region fallthrough
CT: control target
= control target key end

     0   :  { %s1652_s0 = inlined_call_operand.hbm [shape: f32[2,8,32], index: 0, kind: input, shape index: {}]   ;;  %s1653_s1 = inlined_call_operand.hbm [shape: f32[2,8,32], index: 1, kind: input, shape index: {}]   ;;  %s1654_s2 = inlined_call_operand.hbm [shape: f32[32,160], index: 2, kind: input, shape index: {}]   ;;  %s1655_s3 = inlined_call_operand.hbm [shape: f32[32,160], index: 3, kind: input, shape index: {}]   ;;  %s1656_s4 = inlined_call_operand.hbm [shape: f32[32,32], index: 4, kind: input, shape index: {}]   ;;  %s1657_s5 = inlined_call_operand.hbm [shape: f32[4,8,8], index: 5, kind: input, shape index: {}]   ;;  %s1658_s6 = inlined_call_operand.hbm [shape: f32[2,8,32], index: 6, kind: output, shape index: {}]  }
   0x1   :  { %1659 = sst [smem:[#allocation21_spill]] %s1654_s2 }
   0x2   :  { %1660 = sst [smem:[#allocation22_spill]] %s1655_s3 }
   0x3   :  { %1661 = sst [smem:[#allocation23_spill]] %s1656_s4 }
   0x4   :  { %1662 = sst [smem:[#allocation24_spill]] %s1657_s5 }
   0x5   :  { %11 = vsyncpa [#allocation3], 0 }
   0x6   :  { %13 = vsyncpa [#allocation3 + $0x1], 0 }
   0x7   :  { %14 = vsyncpa [#allocation6], 0 }
   0x8   :  { %16 = vsyncpa [#allocation6 + $0x1], 0 }
   0x9   :  { %17 = vsyncpa [#allocation9], 0 }
   0xa   :  { %18 = vsyncpa [#allocation12], 0 }
   0xb   :  { %19 = vsyncpa [#allocation4], 0 }
   0xc   :  { %21 = vsyncpa [#allocation4 + $0x1], 0  ;;  %s1417_s21 = smov 0   ;;  %s1419_s22 = smov 0  }
   0xd   :  { %s1421_s23 = smov 0   ;;  %s1423_s24 = smov 0  }
   0xe LB: > { %s1663_s2 = sld [smem:[#allocation21_spill]]  ;;  %s1441_s28 = sadd.s32 4294967295, %s1361_s24   ;;  %s1361_s24 = sphi %s1423_s24, %s1680_s24   ;;  %s1357_s23 = sphi %s1421_s23, %s1679_s23   ;;  %s1353_s22 = sphi %s1419_s22, %s1678_s22   ;;  %s1349_s21 = sphi %s1417_s21, %s1677_s21  }
   0xf   : > { %p937_p0 = scmp.ge.s32.totalorder %s1361_s24, 1  ;;  %p48_p1 = scmp.eq.s32.totalorder %s1441_s28, 0 }
  0x10   : > { %p194_p2 = scmp.lt.s32.totalorder %s1361_s24, 3  ;;  %s1363_s30 = smov [#allocation7]  }
  0x11   : > { %s207_s7 = sshll.u32 %s1363_s30, 4  ;;  %s1665_s3 = sld [smem:[#allocation22_spill]]  ;;  %s208_s7 = int_to_ptr.vmem [resolvable:$true] %s207_s7 }
  0x12   : > { %p1446_p3 = pnand %p937_p0, %p194_p2  ;;  %s1667_s4 = sld [smem:[#allocation23_spill]] }
  0x13   : > { %s1364_s15 = smov [#allocation8]   ;;  %s1365_s17 = smov 256  }
  0x14   : > { %s205_s27 = sshll.u32 %s1663_s2, 4  ;;  %p998_p4 = pneg %p1446_p3  ;;  %s206_s27 = int_to_ptr.hbm [resolvable:$true] %s205_s27 }
  0x15   : > { %s221_s16 = sshll.u32 %s1364_s15, 4  ;;  %s1366_s18 = smov 16   ;;  %s222_s16 = int_to_ptr.vmem [resolvable:$true] %s221_s16 }
  0x16   : > { %p1458_p6 = pnand %p998_p4, %p48_p1  ;;  %s1367_s19 = smov [#allocation10]  }
  0x17   : > { %s219_s10 = sshll.u32 %s1665_s3, 4  ;;  %s235_s20 = sshll.u32 %s1367_s19, 4  ;;  %s220_s10 = int_to_ptr.hbm [resolvable:$true] %s219_s10  ;;  %s236_s20 = int_to_ptr.vmem [resolvable:$true] %s235_s20 }
  0x18   : > { %s233_s14 = sshll.u32 %s1667_s4, 4  ;;  %s1668_s5 = sld [smem:[#allocation24_spill]]  ;;  %s234_s14 = int_to_ptr.hbm [resolvable:$true] %s233_s14 }
  0x19   : > { %1001 = dma.hbm_to_vmem [thread:$0]  (!%p1458_p6), %s206_s27, 1024, %s208_s7, [#allocation6], %s1365_s17, %s1365_s17, %s1366_s18  }
  0x1a   : > { %1004 = dma.hbm_to_vmem [thread:$0]  (!%p1458_p6), %s220_s10, 1024, %s222_s16, [#allocation9], %s1365_s17, %s1365_s17, %s1366_s18  }
  0x1b   : > { %s1368_s27 = smov 128   ;;  %s1369_s7 = smov 8  }
  0x1c   : > { %1007 = dma.hbm_to_vmem [thread:$0]  (!%p1458_p6), %s234_s14, 512, %s236_s20, [#allocation9], %s1368_s27, %s1368_s27, %s1369_s7  }
  0x1d   : > { %s1370_s8 = smov [#allocation11]   ;;  %s936_s10 = sadd.s32 4294967294, %s1361_s24  }
  0x1e   : > { %s247_s30 = sshll.u32 %s1668_s5, 4  ;;  %s249_s9 = sshll.u32 %s1370_s8, 4  ;;  %s248_s30 = int_to_ptr.hbm [resolvable:$true] %s247_s30  ;;  %s250_s9 = int_to_ptr.vmem [resolvable:$true] %s249_s9 }
  0x1f   : > { %1010 = dma.hbm_to_vmem [thread:$0]  (!%p1458_p6), %s248_s30, 512, %s250_s9, [#allocation12], %s1368_s27, %s1368_s27, %s1369_s7  }
  0x20   : > { %s1478_s12 = sadd.s32 1, %s1361_s24   ;;  %s34_s15 = sadd.s32 1, %s1357_s23 }
  0x21   : > { %s31_s13 = ssub.s32 %s1361_s24, %s1478_s12  ;;  %p41_p8 = scmp.ne.s32.totalorder %s1357_s23, %s1353_s22 }
  0x22   : > { %p32_p7 = scmp.eq.s32.totalorder %s31_s13, 0  ;;  %p42_p9 = scmp.eq.s32.totalorder %s1361_s24, 0 }
  0x23   : > { %p47_p10 = scmp.ne.s32.totalorder %s1353_s22, %s1349_s21  ;;  %p181_p13 = scmp.eq.s32.totalorder %s1441_s28, 1 }
  0x24   : > { %s1489_s14 = scalar_select %p32_p7, %s1357_s23, %s34_s15  }
  0x25   : > { %p1491_p11 = por %p42_p9, %p41_p8  ;;  %p1497_p12 = por %p48_p1, %p47_p10 }
  0x26   : > { %1669 = sst [smem:[#allocation20_spill]] %s1489_s14  ;;  %p187_p0 = scmp.eq.s32.totalorder %s936_s10, 1 }
  0x27   : > { %p1026_p2 = scmp.lt.s32.totalorder %s1361_s24, 2  ;;  %s263_s17 = sand.u32 1, %s1357_s23  }
  0x28   : > { %p1504_p4 = por %p181_p13, %p41_p8  ;;  %p1508_p6 = por %p187_p0, %p47_p10 }
  0x29   : > { %s1512_s20 = sshll.u32 %s263_s17, 3  ;;  %s944_s25 = sshll.u32 %s1361_s24, 3 }
  0x2a   : > { %s271_s27 = scalar_lea.hbm %s1652_s0, %s944_s25  ;;  %s267_s7 = scalar_lea.vmem [#allocation2], %s1512_s20 }
  0x2b   : > { %s275_s8 = sshll.u32 %s267_s7, 4  ;;  %s273_s9 = sshll.u32 %s271_s27, 4  ;;  %s276_s8 = int_to_ptr.vmem [resolvable:$true] %s275_s8  ;;  %s274_s9 = int_to_ptr.hbm [resolvable:$true] %s273_s9 }
  0x2c   : > { %p1521_p7 = pnand %p1026_p2, %p1491_p11  ;;  %s290_s2 = scalar_lea.hbm %s1653_s1, %s944_s25 }
  0x2d   : > { %s282_s3 = sand.u32 1, %s1361_s24   ;;  %s264_s4 = scalar_lea.sflag [#allocation3], %s263_s17 }
  0x2e   : > { %s1219_s26 = sshra.s32 %s274_s9, 4  ;;  %p1223_p9 = pneg %p1521_p7  ;;  %s1220_s26 = int_to_ptr.hbm [resolvable:$true] %s1219_s26 }
  0x2f   : > { %s1221_s30 = scalar_lea.hbm %s1220_s26, 8  ;;  %s1226_s7 = scalar_lea.hbm %s1652_s0, 16 }
  0x30   : > { %p1222_p8 = scmp.ne.s32.totalorder %s1220_s26, %s1221_s30  ;;  %p1227_p13 = scmp.lt.s32.totalorder %s1220_s26, %s1652_s0 }
  0x31   : > { %p1228_p0 = scmp.lt.s32.totalorder %s1226_s7, %s1221_s30 }
  0x32   : > { %p1224_p10 = pnand %p1223_p9, %p1222_p8 }
  0x33   : > { %p1229_p2 = por %p1228_p0, %p1227_p13 }
  0x34   : > { %p1225_p11 = pneg %p1224_p10 }
  0x36   : > { %p1230_p5 = pnand %p1229_p2, %p1225_p11 }
  0x38   : > { %1233 = shalt.err (!%p1230_p5)
}
  0x39   : > { %1014 = dma.hbm_to_vmem [thread:$0]  (!%p1521_p7), %s274_s9, 128, %s276_s8, %s264_s4  }
  0x3a   : > { %s292_s17 = sshll.u32 %s290_s2, 4  ;;  %s286_s25 = scalar_lea.vmem [#allocation5], %s1512_s20  ;;  %s293_s17 = int_to_ptr.hbm [resolvable:$true] %s292_s17 }
  0x3b   : > { %s294_s5 = sshll.u32 %s286_s25, 4  ;;  %s283_s16 = scalar_lea.sflag [#allocation6], %s282_s3  ;;  %s295_s5 = int_to_ptr.vmem [resolvable:$true] %s294_s5 }
  0x3c   : > { %s1249_s27 = sshra.s32 %s293_s17, 4  ;;  %s1256_s7 = scalar_lea.hbm %s1653_s1, 16  ;;  %s1250_s27 = int_to_ptr.hbm [resolvable:$true] %s1249_s27 }
  0x3d   : > { %s1251_s14 = scalar_lea.hbm %s1250_s27, 8  ;;  %p1257_p5 = scmp.lt.s32.totalorder %s1250_s27, %s1653_s1 }
  0x3e   : > { %p1252_p8 = scmp.ne.s32.totalorder %s1250_s27, %s1251_s14  ;;  %p1258_p13 = scmp.lt.s32.totalorder %s1256_s7, %s1251_s14 }
  0x40   : > { %p1254_p10 = pnand %p1252_p8, %p1223_p9  ;;  %p1259_p0 = por %p1258_p13, %p1257_p5 }
  0x42   : > { %p1255_p11 = pneg %p1254_p10 }
  0x44   : > { %p1260_p2 = pnand %p1259_p0, %p1255_p11 }
  0x46   : > { %1263 = shalt.err (!%p1260_p2)
}
  0x47   : > { %1017 = dma.hbm_to_vmem [thread:$0]  (!%p1521_p7), %s293_s17, 128, %s295_s5, %s283_s16  }
  0x48   : > { %303 = sbr.rel (%p1446_p3) target bundleno = 1142 (0x476), region = 44  ;;  %s1557_s2 = sand.u32 (!%p1446_p3), 1, %s1353_s22  }
  0x49   : > { %s1560_s3 = sshll.u32 (!%p1446_p3), %s1557_s2, 3  ;;  %s306_s20 = scalar_lea.sflag (!%p1446_p3), [#allocation3], %s1557_s2 }
  0x4a   : > { %s309_s14 = scalar_lea.vmem (!%p1446_p3), [#allocation2], %s1560_s3 }
  0x4d   : > { %1324 = dma.done.wait (%p1497_p12), %s306_s20, 128  }
  0x4e   : > { %1326 = vsyncadd (%p1497_p12), %s306_s20, 4294967168  ;;  %s315_s5 = sand.u32 1, %s1441_s28   ;;  %s319_s8 = scalar_lea.vmem [#allocation5], %s1560_s3 }
  0x4f   : > { %s316_s29 = scalar_lea.sflag [#allocation6], %s315_s5 }
  0x50   : > { %1328 = dma.done.wait (%p1497_p12), %s316_s29, 128  }
  0x51   : > { %1330 = vsyncadd (%p1497_p12), %s316_s29, 4294967168 }
  0x52   : > { %1332 = dma.done.wait (%p48_p1), [#allocation6], 1024  }
  0x53   : > { %1334 = vsyncadd (%p48_p1), [#allocation6], 4294966272 }
  0x54   : > { %1336 = dma.done.wait (%p48_p1), [#allocation9], 1536  }
  0x55   : > { %1338 = vsyncadd (%p48_p1), [#allocation9], 4294965760 }
  0x56   : > { %1340 = dma.done.wait (%p48_p1), [#allocation12], 512  }
  0x57   : > { %1342 = vsyncadd (%p48_p1), [#allocation12], 4294966784  ;;  %v382_v0 = vld [vmem:[#allocation7 + $0x30] sm:$0xff]  ;;  %v380_v1 = vld [vmem:[#allocation7 + $0x20] sm:$0xff]  ;;  %vm392_vm0 = vcmask 261120   ;;  %s1371_s11 = smov 80  }
  0x58   : > { %451 = vmatpush.msra.mxu2 %v382_v0  ;;  %v390_v2 = vld [vmem:[#allocation8 + $0x30] sm:$0xff]  ;;  %v388_v4 = vld [vmem:[#allocation8 + $0x20] sm:$0xff]  ;;  %s1372_s9 = smov 16   ;;  %s1373_s10 = smov 48   ;;  %vm483_vm1 = vcmask 130048   ;;  %v383_v20 = vld [vmem:[#allocation7 + $0x38] sm:$0xff] }
  0x59   : > { %v378_v3 = vld [vmem:[#allocation7 + $0x10] sm:$0xff]  ;;  %408 = vmatpush.msra.mxu0 %v390_v2  ;;  %v376_v6 = vld [vmem:[#allocation7] sm:$0xff]  ;;  %s1374_s15 = smov 32   ;;  %s1375_s17 = smov 64   ;;  %v381_v21 = vld [vmem:[#allocation7 + $0x28] sm:$0xff]  ;;  %471 = vmatpush.msra.mxu3 %v383_v20  ;;  %vm508_vm2 = vcmask 64512  }
  0x5a   : > { %452 = vmatpush.msra.mxu2 %v380_v1  ;;  %v386_v5 = vld [vmem:[#allocation8 + $0x10] sm:$0xff]  ;;  %v374_v7 = vld [vmem:[%s309_s14] sm:$0xff]  ;;  %s1376_s25 = smov 112   ;;  %s1377_s16 = smov 96   ;;  %v391_v22 = vld [vmem:[#allocation8 + $0x38] sm:$0xff]  ;;  %vm759_vm3 = vcmask 195584  }
  0x5b   : > { %409 = vmatpush.msra.mxu0 %v388_v4  ;;  %v384_v8 = vld [vmem:[#allocation8] sm:$0xff]  ;;  %v375_v9 = vld [vmem:[%s319_s8] sm:$0xff]  ;;  %v389_v23 = vld [vmem:[#allocation8 + $0x28] sm:$0xff]  ;;  %428 = vmatpush.msra.mxu1 %v391_v22  ;;  %s1378_s27 = smov 120   ;;  %s1379_s26 = smov 104  }
  0x5c   : > { %453 = vmatpush.msra.mxu2 %v378_v3  ;;  %v379_v24 = vld [vmem:[#allocation7 + $0x18] sm:$0xff]  ;;  %472 = vmatpush.msra.mxu3 %v381_v21  ;;  %v377_v26 = vld [vmem:[#allocation7 + $0x8] sm:$0xff]  ;;  %v479_v28 = vld [vmem:[#allocation11] sm:$0xff]  ;;  %s1380_s30 = smov 8   ;;  %s1381_s7 = smov 24  }
  0x5d   : > { %410 = vmatpush.msra.mxu0 %v386_v5  ;;  %v387_v25 = vld [vmem:[#allocation8 + $0x18] sm:$0xff]  ;;  %429 = vmatpush.msra.mxu1 %v389_v23  ;;  %v385_v27 = vld [vmem:[#allocation8 + $0x8] sm:$0xff]  ;;  %v612_v35 = vld [vmem:[#allocation11 + $0x10] sm:$0xff]  ;;  %s973_s13 = sshll.u32 %s1441_s28, 3  ;;  %s373_s5 = scalar_lea.vmem [#allocation13], %s1560_s3 }
  0x5e   : > { %454 = vmatpush.msra.mxu2 %v376_v6  ;;  %473 = vmatpush.msra.mxu3 %v379_v24  ;;  %v544_v31 = vld [vmem:[#allocation11 + $0x8] sm:$0xff]  ;;  %v679_v39 = vld [vmem:[#allocation11 + $0x18] sm:$0xff]  ;;  %v763_v23 = vld [vmem:[#allocation10 + $0x10] sm:$0xff]  ;;  %s800_s14 = scalar_lea.hbm %s1658_s6, %s973_s13  ;;  %s802_s29 = sshll.u32 %s373_s5, 4  ;;  %s803_s29 = int_to_ptr.vmem [resolvable:$true] %s802_s29 }
  0x5f   : > { %957 = vmatmul.msk.f32.vlgmr.msra.gmra.mxu2 %vm392_vm0, %v374_v7  ;;  %411 = vmatpush.msra.mxu0 %v384_v8  ;;  %v764_v22 = vld [vmem:[#allocation10 + $0x18] sm:$0xff]  ;;  %v762_v24 = vld [vmem:[#allocation10 + $0x8] sm:$0xff]  ;;  %s804_s8 = sshll.u32 %s800_s14, 4  ;;  %s805_s8 = int_to_ptr.hbm [resolvable:$true] %s804_s8 }
  0x60   : > { %955 = vmatmul.msk.f32.vlgmr.msra.gmra.mxu0 %vm392_vm0, %v375_v9  ;;  %430 = vmatpush.msra.mxu1 %v387_v25  ;;  %v761_v25 = vld [vmem:[#allocation10] sm:$0xff] }
  0x61   : > { %474 = vmatpush.msra.mxu3 %v377_v26 }
  0x62   : > { %958 = vmatmul.msk.f32.vlgmr.msra.gmra.mxu3 %vm392_vm0, %v374_v7  ;;  %431 = vmatpush.msra.mxu1 %v385_v27 }
  0x63   : > { %956 = vmatmul.msk.f32.vlgmr.msra.gmra.mxu1 %vm392_vm0, %v375_v9 }
  0xdd   : > { %v413_v10 = vpop.f32.mrf.mxu0 }
  0xe0   : > { %v433_v46 = vpop.f32.mrf.mxu1 }
  0xe2   : > { %v456_v11 = vpop.f32.mrf.mxu2 }
  0xe3   : > { %v457_v12 = vadd.f32 %v456_v11, %v413_v10 }
  0xe5   : > { %680 = vrot.lane.b32.xlu2 %v457_v12, %s1371_s11  ;;  %682 = vrot.lane.b32.xlu1 %v457_v12, %s1372_s9  ;;  %v476_v49 = vpop.f32.mrf.mxu3  ;;  %s790_s11 = scalar_lea.sflag [#allocation4], %s1557_s2 }
  0xe6   : > { %547 = vrot.lane.b32.xlu0 %v457_v12, %s1373_s10  ;;  %v477_v51 = vadd.f32 %v476_v49, %v433_v46 }
  0xe8   : > { %538 = vmatpush.msrb.mxu1 %v477_v51 }
  0xed   : > { %615 = vrot.lane.b32.xlu2 %v457_v12, %s1374_s15  ;;  %481 = vrot.lane.b32.xlu1 %v457_v12, %s1375_s17  ;;  %s1299_s17 = scalar_lea.hbm %s1658_s6, 16 }
  0xee   : > { %545 = vrot.lane.b32.xlu0 %v457_v12, %s1376_s25 }
  0xf6   : > { %613 = vrot.lane.b32.xlu0 %v457_v12, %s1377_s16 }
 0x13f   : > { %v681_v13 = vpop.permute.xlu2 %680 }
 0x147   : > { %v616_v17 = vpop.permute.xlu2 %615 }
 0x157   : > { %v683_v14 = vpop.permute.xlu1 %682 }
 0x158   : > { %v548_v15 = vpop.permute.xlu0 %547 }
 0x159   : > { %962 = vmatpush.xpose.msk.msrb.mxu2 %vm483_vm1, %v548_v15 }
 0x15d   : > { %968 = vmatpush.xpose.msk.msra.mxu2 %vm483_vm1, %v683_v14 }
 0x15f   : > { %v482_v16 = vpop.permute.xlu1 %481 }
 0x160   : > { %v546_v18 = vpop.permute.xlu0 %545  ;;  %959 = vmatpush.xpose.msk.msrb.mxu0 %vm483_vm1, %v482_v16 }
 0x161   : > { %963 = vmatmul.msk.f32.vlgmr.msrb.gmra.mxu2 %vm483_vm1, %v546_v18 }
 0x163   : > { %960 = vmatmul.msk.f32.vlgmr.msrb.gmra.mxu0 %vm483_vm1, %v457_v12 }
 0x164   : > { %965 = vmatpush.xpose.msk.msra.mxu0 %vm483_vm1, %v616_v17 }
 0x168   : > { %v614_v19 = vpop.permute.xlu0 %613  ;;  %780 = vmatpush.msrb.mxu0 %v764_v22 }
 0x169   : > { %969 = vmatmul.msk.f32.vlgmr.msra.gmra.mxu2 %vm483_vm1, %v681_v13 }
 0x16a   : > { %781 = vmatpush.msrb.mxu0 %v763_v23 }
 0x16b   : > { %966 = vmatmul.msk.f32.vlgmr.msra.gmra.mxu0 %vm483_vm1, %v614_v19 }
 0x16c   : > { %782 = vmatpush.msrb.mxu0 %v762_v24 }
 0x16e   : > { %783 = vmatpush.msrb.mxu0 %v761_v25 }
 0x1e0   : > { %v505_v29 = vpop.f32.mrf.mxu0 }
 0x1e1   : > { %v506_v30 = vadd.f32 %v505_v29, %v479_v28 }
 0x1e3   : > { %v509_v32 = vsel %vm508_vm2, %v506_v30, -inf }
 0x1e4   : > { %v570_v33 = vpop.f32.mrf.mxu2  ;;  %510 = vmax.xlane.f32.xlu2 %v509_v32 }
 0x1e5   : > { %v571_v34 = vadd.f32 %v570_v33, %v544_v31 }
 0x1e7   : > { %v573_v36 = vsel %vm508_vm2, %v571_v34, -inf }
 0x1e8   : > { %574 = vmax.xlane.f32.xlu1 %v573_v36  ;;  %v638_v37 = vpop.f32.mrf.mxu0 }
 0x1e9   : > { %v639_v38 = vadd.f32 %v638_v37, %v612_v35 }
 0x1eb   : > { %v641_v40 = vsel %vm508_vm2, %v639_v38, -inf }
 0x1ec   : > { %v705_v41 = vpop.f32.mrf.mxu2  ;;  %642 = vmax.xlane.f32.xlu2 %v641_v40 }
 0x1ed   : > { %v706_v42 = vadd.f32 %v705_v41, %v679_v39 }
 0x1ef   : > { %v708_v43 = vsel %vm508_vm2, %v706_v42, -inf }
 0x1f0   : > { %709 = vmax.xlane.f32.xlu0 %v708_v43 }
 0x257   : > { %v511_v44 = vpop.xlane.xlu2 %510 }
 0x258   : > { %v512_v45 = vsub.f32 %v506_v30, %v511_v44 }
 0x25a   : > { %v513_v47 = vmul.f32 1.442695, %v512_v45 }
 0x25b   : > { %v575_v48 = vpop.xlane.xlu1 %574 }
 0x25c   : > { %1083 = vpow2.f32 %v513_v47  ;;  %v576_v50 = vsub.f32 %v571_v34, %v575_v48 }
 0x25e   : > { %v577_v52 = vmul.f32 1.442695, %v576_v50 }
 0x25f   : > { %v643_v53 = vpop.xlane.xlu2 %642 }
 0x260   : > { %1085 = vpow2.f32 %v577_v52  ;;  %v644_v54 = vsub.f32 %v639_v38, %v643_v53 }
 0x262   : > { %v1084_v55 = vpop.eup %1083  ;;  %v645_v56 = vmul.f32 1.442695, %v644_v54 }
 0x263   : > { %v710_v57 = vpop.xlane.xlu0 %709  ;;  %v515_v58 = vsel %vm508_vm2, %v1084_v55, 0.0 }
 0x264   : > { %1087 = vpow2.f32 %v645_v56  ;;  %v711_v59 = vsub.f32 %v706_v42, %v710_v57  ;;  %516 = vadd.xlane.f32.xlu2 %v515_v58 }
 0x266   : > { %v1086_v60 = vpop.eup %1085  ;;  %v712_v61 = vmul.f32 1.442695, %v711_v59 }
 0x267   : > { %v579_v62 = vsel %vm508_vm2, %v1086_v60, 0.0 }
 0x268   : > { %1089 = vpow2.f32 %v712_v61  ;;  %580 = vadd.xlane.f32.xlu1 %v579_v62 }
 0x26a   : > { %v1088_v63 = vpop.eup %1087 }
 0x26b   : > { %v647_v0 = vsel %vm508_vm2, %v1088_v63, 0.0 }
 0x26c   : > { %648 = vadd.xlane.f32.xlu2 %v647_v0 }
 0x26e   : > { %v1090_v1 = vpop.eup %1089 }
 0x26f   : > { %v714_v2 = vsel %vm508_vm2, %v1090_v1, 0.0 }
 0x270   : > { %715 = vadd.xlane.f32.xlu0 %v714_v2 }
 0x281   : > { %585 = vrot.lane.b32.xlu1 %v477_v51, %s1378_s27 }
 0x284   : > { %719 = vrot.lane.b32.xlu0 %v477_v51, %s1379_s26  ;;  %652 = vrot.lane.b32.xlu2 %v477_v51, %s1376_s25 }
 0x2d7   : > { %v517_v3 = vpop.xlane.xlu2 %516 }
 0x2d8   : > { %1091 = vrcp.f32 %v517_v3 }
 0x2db   : > { %v581_v8 = vpop.xlane.xlu1 %580 }
 0x2de   : > { %v1092_v4 = vpop.eup %1091 }
 0x2df   : > { %v649_v5 = vpop.xlane.xlu2 %648  ;;  %v519_v6 = vmul.f32 %v1092_v4, %v1084_v55 }
 0x2e0   : > { %1093 = vrcp.f32 %v649_v5 }
 0x2e1   : > { %961 = vmatmul.msk.f32.vlgmr.msrb.gmra.mxu1 %vm508_vm2, %v519_v6  ;;  %1095 = vrcp.f32 %v581_v8 }
 0x2e3   : > { %v716_v11 = vpop.xlane.xlu0 %715 }
 0x2e4   : > { %1097 = vrcp.f32 %v716_v11 }
 0x2e6   : > { %v1094_v7 = vpop.eup %1093 }
 0x2e7   : > { %v651_v9 = vmul.f32 %v1094_v7, %v1088_v63  ;;  %v653_v10 = vpop.permute.xlu2 %652  ;;  %v1096_v12 = vpop.eup %1095 }
 0x2e8   : > { %673 = vmatpush.msra.mxu1 %v653_v10  ;;  %v583_v14 = vmul.f32 %v1096_v12, %v1086_v60 }
 0x2e9   : > { %967 = vmatmul.msk.f32.vlgmr.msra.gmra.mxu1 %vm508_vm2, %v651_v9 }
 0x2ea   : > { %v1098_v16 = vpop.eup %1097 }
 0x2eb   : > { %v718_v17 = vmul.f32 %v1098_v16, %v1090_v1 }
 0x2f3   : > { %v586_v13 = vpop.permute.xlu1 %585 }
 0x2f4   : > { %606 = vmatpush.msrb.mxu3 %v586_v13 }
 0x2f5   : > { %964 = vmatmul.msk.f32.vlgmr.msrb.gmra.mxu3 %vm508_vm2, %v583_v14 }
 0x2f6   : > { %v720_v15 = vpop.permute.xlu0 %719 }
 0x2f7   : > { %740 = vmatpush.msra.mxu3 %v720_v15 }
 0x2fd   : > { %970 = vmatmul.msk.f32.vlgmr.msra.gmra.mxu3 %vm508_vm2, %v718_v17 }
 0x35e   : > { %v540_v18 = vpop.f32.mrf.mxu1 }
 0x366   : > { %v675_v19 = vpop.f32.mrf.mxu1 }
 0x367   : > { %750 = vrot.lane.b32.xlu0 %v675_v19, %s1372_s9  ;;  %s1293_s9 = sshra.s32 %s805_s8, 4  ;;  %s1294_s9 = int_to_ptr.hbm [resolvable:$true] %s1293_s9 }
 0x368   : > { %s1295_s10 = scalar_lea.hbm %s1294_s9, 8  ;;  %p1300_p7 = scmp.lt.s32.totalorder %s1294_s9, %s1658_s6 }
 0x369   : > { %p1296_p1 = scmp.ne.s32.totalorder %s1294_s9, %s1295_s10  ;;  %p1301_p9 = scmp.lt.s32.totalorder %s1299_s17, %s1295_s10 }
 0x36b   : > { %p1297_p3 = pnand %p1296_p1, %p1504_p4  ;;  %p1302_p8 = por %p1301_p9, %p1300_p7 }
 0x36d   : > { %p1298_p12 = pneg %p1297_p3 }
 0x36f   : > { %p1303_p10 = pnand %p1302_p8, %p1298_p12 }
 0x378   : > { %v608_v20 = vpop.f32.mrf.mxu3 }
 0x379   : > { %746 = vrot.lane.b32.xlu1 %v608_v20, %s1380_s30 }
 0x380   : > { %v742_v21 = vpop.f32.mrf.mxu3 }
 0x381   : > { %754 = vrot.lane.b32.xlu1 %v742_v21, %s1381_s7 }
 0x3d9   : > { %v751_v28 = vpop.permute.xlu0 %750 }
 0x3eb   : > { %v747_v26 = vpop.permute.xlu1 %746 }
 0x3ec   : > { %v757_v27 = vsel %vm508_vm2, %v540_v18, %v747_v26 }
 0x3ed   : > { %v758_v30 = vsel %vm483_vm1, %v757_v27, %v751_v28 }
 0x3f3   : > { %v755_v29 = vpop.permute.xlu1 %754 }
 0x3f4   : > { %v760_v31 = vsel %vm759_vm3, %v758_v30, %v755_v29 }
 0x3f5   : > { %971 = vmatmul.msk.f32.vlgmr.msrb.gmra.mxu0 %vm392_vm0, %v760_v31 }
 0x472   : > { %v785_v32 = vpop.f32.mrf.mxu0 }
 0x473   : > { %788 = vst.msk [vmem:[%s373_s5] sm:$0xff] %vm392_vm0, %v785_v32 }
 0x474   : > { %1306 = shalt.err (!%p1303_p10)
}
 0x475   : > { %996 = dma.vmem_to_hbm [thread:$0]  (%p1504_p4), %s803_s29, 128, %s805_s8, %s790_s11  }
 0x476 PF: > { %s816_s2 = sand.u32 1, %s1349_s21   ;;  %p1675_p11 = scmp.ge.s32.totalorder %s1361_s24, 2 }
 0x477   : > { %s817_s16 = scalar_lea.sflag [#allocation4], %s816_s2 }
 0x478   : > { %p1019_p5 = pnand %p1675_p11, %p1508_p6 }
 0x47a   : > { %p1020_p13 = pneg %p1019_p5 }
 0x47c   : > { %1344 = dma.done.wait (%p1020_p13), %s817_s16, 128  }
 0x47d   : > { %1346 = vsyncadd (%p1020_p13), %s817_s16, 4294967168  ;;  %s1676_s27 = sld [smem:[#allocation20_spill]]  ;;  %p24_p0 = scmp.ge.s32.totalorder %s1478_s12, 4  }
 0x47e   : > { %s1677_s21 = smov %s1353_s22  ;;  %s1678_s22 = smov %s1357_s23 }
 0x47f   : > { %s1680_s24 = smov %s1478_s12  ;;  %26 = sbr.rel (!%p24_p0) target bundleno = 14 (0xe), region = 121 }
 0x483   : > { %s1679_s23 = smov %s1676_s27 }
 0x484   :  { %823 = vsyncpa [#allocation3], 1 }
 0x485   :  { %825 = vsyncpa [#allocation3 + $0x1], 1 }
 0x486   :  { %826 = vsyncpa [#allocation6], 1 }
 0x487   :  { %828 = vsyncpa [#allocation6 + $0x1], 1 }
 0x488   :  { %829 = vsyncpa [#allocation9], 1 }
 0x489   :  { %830 = vsyncpa [#allocation12], 1 }
 0x48a   :  { %831 = vsyncpa [#allocation4], 1 }
 0x48b   :  { %833 = vsyncpa [#allocation4 + $0x1], 1 }

</bundles_post_ra>
